<compile_context>
chip_gen: v7x
topology: tpu7x:2x2x1
jax: 0.10.0
libtpu: 0.0.40
codegen_flags: <defaults>
</compile_context>

<pallas_src>
import functools
import warnings

import jax
import jax.numpy as jnp
from jax.experimental import pallas as pl
from jax.experimental.pallas import tpu as pltpu


# --------------------------------------------------------------------------
# Parameter construction (mirrors the PyTorch __init__ exactly; deterministic)
# --------------------------------------------------------------------------
def sin_cos_pos_emb_1d(pos: int, dim: int):
    assert dim % 4 == 0
    p = jnp.arange(pos, dtype=jnp.float32)
    omega = jnp.arange(dim // 4, dtype=jnp.float32) / (dim / 4.0)
    omega = 1.0 / (10000.0 ** omega)
    emb = jnp.einsum("m,d->md", p, omega)          # (pos, dim//4)
    emb = emb.T                                     # (dim//4, pos)
    return jnp.sin(emb), jnp.cos(emb)


def rotatory_pos_emb_2d(H: int, W: int, C: int):
    sin_x, cos_x = sin_cos_pos_emb_1d(W, C)                     # (C//4, W)
    sin_x = jnp.tile(sin_x[:, None, :], (2, H, 1))              # (C//2, H, W)
    cos_x = jnp.tile(cos_x[:, None, :], (2, H, 1))
    sin_y, cos_y = sin_cos_pos_emb_1d(H, C)                     # (C//4, H)
    sin_y = jnp.tile(sin_y[:, :, None], (2, 1, W))              # (C//2, H, W)
    cos_y = jnp.tile(cos_y[:, :, None], (2, 1, W))
    return jnp.stack((sin_x, cos_x, sin_y, cos_y), axis=0)      # (4, C//2, H, W)


# --------------------------------------------------------------------------
# Pallas kernel: fused swizzle + rotation
#
# In the (B, C//4, 4*H*W) view (slab q holds channel 4i+q over H*W), the torch
# forward is, per quad i (sign already folded into SIN, tables laid out per
# output slab):
#   out[:, q] = x[:, A[q]] * COS[:, q] + x[:, B[q]] * SIN[:, q]
# with A = (0, 2, 1, 3), B = (1, 3, 0, 2).  Output slabs (0, 2) read input
# slabs (0, 1); output slabs (1, 3) read input slabs (2, 3), so each input
# slab is loaded from VMEM exactly once per pair.
# --------------------------------------------------------------------------
_SLAB_PAIRS = (((0, 2), (0, 1)), ((1, 3), (2, 3)))


def _rope2d_kernel(x_ref, cos_ref, sin_ref, o_ref, *, hw):
    # x_ref / o_ref blocks: (1, ct4, 4*hw); cos_ref / sin_ref: (ct4, 4*hw)
    # Compute in f32 (safe on every generation; kernel is HBM-bound so the
    # upcast is free).  TODO(synk): optional bf16 VALU path for v6e/v7x.
    for (qa, qb), (sa, sb) in _SLAB_PAIRS:   # static, fully unrolled
        xa = x_ref[0, :, pl.ds(sa * hw, hw)].astype(jnp.float32)
        xb = x_ref[0, :, pl.ds(sb * hw, hw)].astype(jnp.float32)
        # out slab qa = xa * cos[qa] + xb * sin[qa]
        ca = cos_ref[:, pl.ds(qa * hw, hw)].astype(jnp.float32)
        na = sin_ref[:, pl.ds(qa * hw, hw)].astype(jnp.float32)
        o_ref[0, :, pl.ds(qa * hw, hw)] = (xa * ca + xb * na).astype(o_ref.dtype)
        # out slab qb = xb * cos[qb] + xa * sin[qb]
        cb = cos_ref[:, pl.ds(qb * hw, hw)].astype(jnp.float32)
        nb = sin_ref[:, pl.ds(qb * hw, hw)].astype(jnp.float32)
        o_ref[0, :, pl.ds(qb * hw, hw)] = (xb * cb + xa * nb).astype(o_ref.dtype)


# ~3 MiB blocks amortize the ~0.35 us per-step overhead to <10% even at v7x
# HBM bandwidth; 8 resident buffers (x, cos, sin, out, double-buffered) stay
# around 24 MiB, comfortably inside the 48 MiB scoped limit (v7x physical
# VMEM is only 64 MiB, so do NOT raise this to 64 MiB).
_TARGET_BLOCK_BYTES = 3 << 20
_VMEM_LIMIT_BYTES = 48 << 20


def _cdiv(a: int, b: int) -> int:
    return -(-a // b)


def _pick_channel_tile(c4: int, row_bytes: int, itemsize: int,
                       target_bytes: int = _TARGET_BLOCK_BYTES) -> int:
    """Channel-tile size: largest sublane-aligned tile near the byte budget.

    Alignment of the second-to-last block dim is dtype aware (8 rows for f32,
    16 for bf16/f16, 32 for int8/fp8).  A full-extent block (== c4) is always
    legal, so it is used whenever it fits the budget or c4 is below alignment.
    Otherwise tiles are roughly equal, aligned, and the grid uses cdiv (the
    boundary block is masked by Pallas), so awkward c4 values never force a
    pathologically small or oversized block.
    """
    align = max(8, 32 // max(1, itemsize))
    full_bytes = c4 * row_bytes
    if c4 <= align or full_bytes <= target_bytes:
        return c4
    n_blocks = max(1, _cdiv(full_bytes, target_bytes))
    ct4 = _cdiv(c4, n_blocks)
    ct4 = _cdiv(ct4, align) * align          # round up to sublane alignment
    return min(ct4, c4)


def _rope2d_pallas(x3, cos_t, sin_t):
    B, C4, L = x3.shape                # L = 4 * H * W (lane axis, kept whole)
    hw = L // 4
    ct4 = _pick_channel_tile(C4, L * x3.dtype.itemsize, x3.dtype.itemsize)
    kernel = functools.partial(_rope2d_kernel, hw=hw)
    return pl.pallas_call(
        kernel,
        out_shape=jax.ShapeDtypeStruct((B, C4, L), x3.dtype),
        # Channel tiles outermost, batch innermost: cos/sin block indices are
        # constant across the inner axis, so each table tile is fetched once.
        grid=(pl.cdiv(C4, ct4), B),
        in_specs=[
            pl.BlockSpec((1, ct4, L), lambda ci, b: (b, ci, 0)),
            pl.BlockSpec((ct4, L), lambda ci, b: (ci, 0)),
            pl.BlockSpec((ct4, L), lambda ci, b: (ci, 0)),
        ],
        out_specs=pl.BlockSpec((1, ct4, L), lambda ci, b: (b, ci, 0)),
        compiler_params=pltpu.CompilerParams(
            dimension_semantics=("parallel", "parallel"),
            vmem_limit_bytes=_VMEM_LIMIT_BYTES,
        ),
    )(x3, cos_t, sin_t)


@jax.jit
def _rope2d_apply(x, cos_t, sin_t):
    B, C, H, W = x.shape
    x3 = x.reshape(B, C // 4, 4 * H * W)      # free reshape (contiguous)
    out = _rope2d_pallas(x3, cos_t, sin_t)
    return out.reshape(B, C, H, W)            # free reshape back to NCHW


# --------------------------------------------------------------------------
# Module wrapper
# --------------------------------------------------------------------------
class RotatoryPosEmb2d:
    def __init__(self, height: int, width: int, dim: int):
        assert dim % 4 == 0
        self.sin_pos_emb = rotatory_pos_emb_2d(height, width, dim)  # (4, C//2, H, W)
        self.C, self.H, self.W = dim, height, width
        self._table_cache = {}

    def _tables(self, H, W, start, step, dtype):
        """(C//4, 4*H*W) cos / sign-folded sin tables, cached per config.

        Tables are kept in the compute dtype of x for exact parity with the
        reference.  TODO(synk): for tiny batches the tables could be stored
        in bf16 (|sin|,|cos| <= 1) to roughly halve table HBM bytes.
        """
        key = (H, W, start, step, jnp.dtype(dtype).name)
        hit = self._table_cache.get(key)
        if hit is not None:
            return hit
        C4 = self.C // 4
        pe = self.sin_pos_emb[..., start::step, start::step][..., :H, :W]
        sin_x, cos_x, sin_y, cos_y = pe[0], pe[1], pe[2], pe[3]      # (C//2, H, W)
        sx = sin_x.reshape(C4, 2, H, W)
        cx = cos_x.reshape(C4, 2, H, W)
        sy = sin_y.reshape(C4, 2, H, W)
        cy = cos_y.reshape(C4, 2, H, W)
        # Per output slab q = 0..3: cos = [cx0, cy0, cx1, cy1],
        # sin (sign folded) = [-sx0, -sy0, sx1, sy1].
        cos_t = jnp.stack([cx[:, 0], cy[:, 0], cx[:, 1], cy[:, 1]], axis=1)
        sin_t = jnp.stack([-sx[:, 0], -sy[:, 0], sx[:, 1], sy[:, 1]], axis=1)
        cos_t = cos_t.reshape(C4, 4 * H * W).astype(dtype)
        sin_t = sin_t.reshape(C4, 4 * H * W).astype(dtype)
        tables = (cos_t, sin_t)
        self._table_cache[key] = tables
        return tables

    def __call__(self, x, start: int = 0, step: int = 1):
        B, C, H, W = x.shape
        assert C == self.C and H <= self.H and W <= self.W
        if (H * W) % 128 != 0:
            # Still numerically correct, but the in-kernel slab slices/stores
            # are no longer lane-aligned (masked stores / relayouts).
            warnings.warn(
                "RotatoryPosEmb2d: H*W=%d is not a multiple of 128; kernel "
                "falls off the lane-dense fast path." % (H * W))
        cos_t, sin_t = self._tables(H, W, start, step, x.dtype)
        return _rope2d_apply(x, cos_t, sin_t)


# --------------------------------------------------------------------------
# Pure-JAX reference (direct transcription of the torch forward) for checking
# --------------------------------------------------------------------------
def forward_ref(x, emb, start=0, step=1):
    B, C, H, W = x.shape
    x0, x1, x2, x3 = x[:, 0::4], x[:, 1::4], x[:, 2::4], x[:, 3::4]
    pe = emb[..., start::step, start::step]
    sin_x, cos_x, sin_y, cos_y = pe[..., :H, :W]
    x01 = jnp.stack((x0, x1), axis=2).reshape(B, -1, H, W)
    x_10 = jnp.stack((-x1, x0), axis=2).reshape(B, -1, H, W)
    x23 = jnp.stack((x2, x3), axis=2).reshape(B, -1, H, W)
    x_32 = jnp.stack((-x3, x2), axis=2).reshape(B, -1, H, W)
    x01_ = x01 * cos_x + x_10 * sin_x
    x23_ = x23 * cos_y + x_32 * sin_y
    return jnp.stack((x01_, x23_), axis=2).reshape(B, C, H, W)


if __name__ == "__main__":
    key = jax.random.PRNGKey(0)

    # Main check: B=2, C=8, H=W=16 (HW multiple of 128 -> lane-dense slabs).
    B, C, H, W = 2, 8, 16, 16
    x = jax.random.normal(key, (B, C, H, W), dtype=jnp.float32)
    module = RotatoryPosEmb2d(height=H, width=W, dim=C)
    out = jax.block_until_ready(module(x))            # start=0, step=1
    ref = forward_ref(x, module.sin_pos_emb)
    assert out.shape == (B, C, H, W)
    assert jnp.allclose(out, ref, atol=1e-5, rtol=1e-5)

    # Second config: different quad count / spatial size.
    B2, C2, H2, W2 = 1, 16, 8, 16
    x2 = jax.random.normal(jax.random.PRNGKey(1), (B2, C2, H2, W2), dtype=jnp.float32)
    module2 = RotatoryPosEmb2d(height=H2, width=W2, dim=C2)
    out2 = jax.block_until_ready(module2(x2))
    ref2 = forward_ref(x2, module2.sin_pos_emb)
    assert jnp.allclose(out2, ref2, atol=1e-5, rtol=1e-5)

    print("KERNEL_OK")
</pallas_src>

<mosaic_0001>
module attributes {stable_mosaic.version = 11 : i64} {
  func.func @_rope2d_kernel(%arg0: i32, %arg1: i32, %arg2: memref<1x2x1024xf32, #tpu.memory_space<vmem>>, %arg3: memref<2x1024xf32, #tpu.memory_space<vmem>>, %arg4: memref<2x1024xf32, #tpu.memory_space<vmem>>, %arg5: memref<1x2x1024xf32, #tpu.memory_space<vmem>>) attributes {dimension_semantics = [#tpu.dimension_semantics<parallel>, #tpu.dimension_semantics<parallel>], iteration_bounds = array<i64: 1, 2>, scalar_prefetch = 0 : i64, scratch_operands = 0 : i64, tpu.core_type = #tpu.core_type<tc>, window_params = [{transform_indices = @transform_0, window_bounds = array<i64: 1, 2, 1024>}, {transform_indices = @transform_1, window_bounds = array<i64: 2, 1024>}, {transform_indices = @transform_2, window_bounds = array<i64: 2, 1024>}, {transform_indices = @transform_3, window_bounds = array<i64: 1, 2, 1024>}]} {
    %c0 = arith.constant 0 : index
    %c0_0 = arith.constant 0 : index
    %c0_1 = arith.constant 0 : index
    %0 = vector.load %arg2[%c0, %c0_0, %c0_1] : memref<1x2x1024xf32, #tpu.memory_space<vmem>>, vector<1x2x256xf32>
    %1 = vector.shape_cast %0 : vector<1x2x256xf32> to vector<2x256xf32>
    %c0_2 = arith.constant 0 : index
    %c0_3 = arith.constant 0 : index
    %c256 = arith.constant 256 : index
    %2 = vector.load %arg2[%c0_2, %c0_3, %c256] : memref<1x2x1024xf32, #tpu.memory_space<vmem>>, vector<1x2x256xf32>
    %3 = vector.shape_cast %2 : vector<1x2x256xf32> to vector<2x256xf32>
    %c0_4 = arith.constant 0 : index
    %c0_5 = arith.constant 0 : index
    %4 = vector.load %arg3[%c0_4, %c0_5] : memref<2x1024xf32, #tpu.memory_space<vmem>>, vector<2x256xf32>
    %c0_6 = arith.constant 0 : index
    %c0_7 = arith.constant 0 : index
    %5 = vector.load %arg4[%c0_6, %c0_7] : memref<2x1024xf32, #tpu.memory_space<vmem>>, vector<2x256xf32>
    %6 = arith.mulf %1, %4 : vector<2x256xf32>
    %7 = arith.mulf %3, %5 : vector<2x256xf32>
    %8 = arith.addf %6, %7 : vector<2x256xf32>
    %c0_8 = arith.constant 0 : index
    %c0_9 = arith.constant 0 : index
    %c0_10 = arith.constant 0 : index
    %9 = vector.load %arg5[%c0_8, %c0_9, %c0_10] : memref<1x2x1024xf32, #tpu.memory_space<vmem>>, vector<1x2x256xf32>
    %10 = vector.shape_cast %9 : vector<1x2x256xf32> to vector<2x256xf32>
    %11 = vector.shape_cast %8 : vector<2x256xf32> to vector<1x2x256xf32>
    tpu.vector_store %arg5[%c0_8, %c0_9, %c0_10], %11 {strides = array<i32>} : memref<1x2x1024xf32, #tpu.memory_space<vmem>>, vector<1x2x256xf32>,
    %c0_11 = arith.constant 0 : index
    %c512 = arith.constant 512 : index
    %12 = vector.load %arg3[%c0_11, %c512] : memref<2x1024xf32, #tpu.memory_space<vmem>>, vector<2x256xf32>
    %c0_12 = arith.constant 0 : index
    %c512_13 = arith.constant 512 : index
    %13 = vector.load %arg4[%c0_12, %c512_13] : memref<2x1024xf32, #tpu.memory_space<vmem>>, vector<2x256xf32>
    %14 = arith.mulf %3, %12 : vector<2x256xf32>
    %15 = arith.mulf %1, %13 : vector<2x256xf32>
    %16 = arith.addf %14, %15 : vector<2x256xf32>
    %c0_14 = arith.constant 0 : index
    %c0_15 = arith.constant 0 : index
    %c512_16 = arith.constant 512 : index
    %17 = vector.load %arg5[%c0_14, %c0_15, %c512_16] : memref<1x2x1024xf32, #tpu.memory_space<vmem>>, vector<1x2x256xf32>
    %18 = vector.shape_cast %17 : vector<1x2x256xf32> to vector<2x256xf32>
    %19 = vector.shape_cast %16 : vector<2x256xf32> to vector<1x2x256xf32>
    tpu.vector_store %arg5[%c0_14, %c0_15, %c512_16], %19 {strides = array<i32>} : memref<1x2x1024xf32, #tpu.memory_space<vmem>>, vector<1x2x256xf32>,
    %c0_17 = arith.constant 0 : index
    %c0_18 = arith.constant 0 : index
    %c512_19 = arith.constant 512 : index
    %20 = vector.load %arg2[%c0_17, %c0_18, %c512_19] : memref<1x2x1024xf32, #tpu.memory_space<vmem>>, vector<1x2x256xf32>
    %21 = vector.shape_cast %20 : vector<1x2x256xf32> to vector<2x256xf32>
    %c0_20 = arith.constant 0 : index
    %c0_21 = arith.constant 0 : index
    %c768 = arith.constant 768 : index
    %22 = vector.load %arg2[%c0_20, %c0_21, %c768] : memref<1x2x1024xf32, #tpu.memory_space<vmem>>, vector<1x2x256xf32>
    %23 = vector.shape_cast %22 : vector<1x2x256xf32> to vector<2x256xf32>
    %c0_22 = arith.constant 0 : index
    %c256_23 = arith.constant 256 : index
    %24 = vector.load %arg3[%c0_22, %c256_23] : memref<2x1024xf32, #tpu.memory_space<vmem>>, vector<2x256xf32>
    %c0_24 = arith.constant 0 : index
    %c256_25 = arith.constant 256 : index
    %25 = vector.load %arg4[%c0_24, %c256_25] : memref<2x1024xf32, #tpu.memory_space<vmem>>, vector<2x256xf32>
    %26 = arith.mulf %21, %24 : vector<2x256xf32>
    %27 = arith.mulf %23, %25 : vector<2x256xf32>
    %28 = arith.addf %26, %27 : vector<2x256xf32>
    %c0_26 = arith.constant 0 : index
    %c0_27 = arith.constant 0 : index
    %c256_28 = arith.constant 256 : index
    %29 = vector.load %arg5[%c0_26, %c0_27, %c256_28] : memref<1x2x1024xf32, #tpu.memory_space<vmem>>, vector<1x2x256xf32>
    %30 = vector.shape_cast %29 : vector<1x2x256xf32> to vector<2x256xf32>
    %31 = vector.shape_cast %28 : vector<2x256xf32> to vector<1x2x256xf32>
    tpu.vector_store %arg5[%c0_26, %c0_27, %c256_28], %31 {strides = array<i32>} : memref<1x2x1024xf32, #tpu.memory_space<vmem>>, vector<1x2x256xf32>,
    %c0_29 = arith.constant 0 : index
    %c768_30 = arith.constant 768 : index
    %32 = vector.load %arg3[%c0_29, %c768_30] : memref<2x1024xf32, #tpu.memory_space<vmem>>, vector<2x256xf32>
    %c0_31 = arith.constant 0 : index
    %c768_32 = arith.constant 768 : index
    %33 = vector.load %arg4[%c0_31, %c768_32] : memref<2x1024xf32, #tpu.memory_space<vmem>>, vector<2x256xf32>
    %34 = arith.mulf %23, %32 : vector<2x256xf32>
    %35 = arith.mulf %21, %33 : vector<2x256xf32>
    %36 = arith.addf %34, %35 : vector<2x256xf32>
    %c0_33 = arith.constant 0 : index
    %c0_34 = arith.constant 0 : index
    %c768_35 = arith.constant 768 : index
    %37 = vector.load %arg5[%c0_33, %c0_34, %c768_35] : memref<1x2x1024xf32, #tpu.memory_space<vmem>>, vector<1x2x256xf32>
    %38 = vector.shape_cast %37 : vector<1x2x256xf32> to vector<2x256xf32>
    %39 = vector.shape_cast %36 : vector<2x256xf32> to vector<1x2x256xf32>
    tpu.vector_store %arg5[%c0_33, %c0_34, %c768_35], %39 {strides = array<i32>} : memref<1x2x1024xf32, #tpu.memory_space<vmem>>, vector<1x2x256xf32>,
    return
  }
  func.func @transform_0(%arg0: i32, %arg1: i32) -> (i32, i32, i32) {
    %c0_i32 = arith.constant 0 : i32
    %c0_i32_0 = arith.constant 0 : i32
    return %arg1, %arg0, %c0_i32 : i32, i32, i32
  }
  func.func @transform_1(%arg0: i32, %arg1: i32) -> (i32, i32) {
    %c0_i32 = arith.constant 0 : i32
    %c0_i32_0 = arith.constant 0 : i32
    return %arg0, %c0_i32 : i32, i32
  }
  func.func @transform_2(%arg0: i32, %arg1: i32) -> (i32, i32) {
    %c0_i32 = arith.constant 0 : i32
    %c0_i32_0 = arith.constant 0 : i32
    return %arg0, %c0_i32 : i32, i32
  }
  func.func @transform_3(%arg0: i32, %arg1: i32) -> (i32, i32, i32) {
    %c0_i32 = arith.constant 0 : i32
    %c0_i32_0 = arith.constant 0 : i32
    return %arg1, %arg0, %c0_i32 : i32, i32, i32
  }
}

</mosaic_0001>

<bundles_post_ra>
// kernel: _rope2d_apply.1
= control target key start
LH: loop header
LB: loop body
LE: loop exit
PB: predicated region body
PF: predicated region fallthrough
CT: control target
= control target key end

     0   :  { %s481_s12 = smov 0   ;;  %s483_s13 = smov 0   ;;  %s538_s0 = inlined_call_operand.vmem [shape: f32[2,2,1024], index: 0, kind: input, shape index: {}]   ;;  %s539_s1 = inlined_call_operand.vmem [shape: f32[2,1024], index: 1, kind: input, shape index: {}]   ;;  %s540_s2 = inlined_call_operand.vmem [shape: f32[2,1024], index: 2, kind: input, shape index: {}]   ;;  %s541_s3 = inlined_call_operand.vmem [shape: f32[2,2,1024], index: 3, kind: output, shape index: {}]  }
   0x1   :  { %s485_s14 = smov 0  }
   0x2 LB: > { %s22_s15 = sadd.s32 1, %s455_s13  ;;  %p404_p0 = scmp.ge.s32.totalorder %s459_s14, 1  ;;  %s459_s14 = sphi %s485_s14, %s13_s14   ;;  %s455_s13 = sphi %s483_s13, %s543_s13   ;;  %s451_s12 = sphi %s481_s12, %s542_s12  }
   0x3   : > { %p23_p1 = scmp.ge.s32.totalorder %s22_s15, 2  ;;  %p177_p2 = scmp.lt.s32.totalorder %s459_s14, 3 }
   0x5   : > { %s545_s15 = smov (%p23_p1, %s22_s15), 0  ;;  %p178_p3 = pnand %p404_p0, %p177_p2 }
   0x6   : > { %p219_p4 = scmp.lt.s32.totalorder (!%p178_p3), %s451_s12, 1  ;;  %v249_v0 = vld [vmem:[%s539_s1] sm:$0xf] (!%p178_p3)  ;;  %v255_v2 = vld [vmem:[%s539_s1 + $0x8] sm:$0xf] (!%p178_p3) }
   0x7   : > { %181 = sbr.rel (%p178_p3) target bundleno = 24 (0x18), region = 32  ;;  %v250_v1 = vld [vmem:[%s540_s2] sm:$0xf] (!%p178_p3)  ;;  %v256_v3 = vld [vmem:[%s540_s2 + $0x8] sm:$0xf] (!%p178_p3) }
   0x8   : > { %v263_v4 = vld [vmem:[%s539_s1 + $0x4] sm:$0xf] (!%p178_p3)  ;;  %v269_v6 = vld [vmem:[%s539_s1 + $0xc] sm:$0xf] (!%p178_p3) }
   0x9   : > { %v264_v5 = vld [vmem:[%s540_s2 + $0x4] sm:$0xf] (!%p178_p3)  ;;  %v270_v7 = vld [vmem:[%s540_s2 + $0xc] sm:$0xf] (!%p178_p3) }
   0xe   : > { %s547_s12 = smov (!%p219_p4, %s451_s12), 1 }
   0xf   : > { %s411_s22 = sshll.u32 %s547_s12, 4 }
  0x10   : > { %s227_s29 = scalar_lea.vmem %s538_s0, %s411_s22  ;;  %s246_s11 = scalar_lea.vmem %s541_s3, %s411_s22 }
  0x11   : > { %v247_v8 = vld [vmem:[%s227_s29] sm:$0xf]  ;;  %v248_v9 = vld [vmem:[%s227_s29 + $0x4] sm:$0xf]  ;;  %v261_v10 = vld [vmem:[%s227_s29 + $0x8] sm:$0xf] }
  0x12   : > { %v251_v11 = vmul.f32 %v249_v0, %v247_v8  ;;  %v252_v12 = vmul.f32 %v250_v1, %v248_v9  ;;  %v257_v13 = vmul.f32 %v255_v2, %v248_v9  ;;  %v258_v14 = vmul.f32 %v256_v3, %v247_v8  ;;  %v262_v15 = vld [vmem:[%s227_s29 + $0xc] sm:$0xf] }
  0x13   : > { %v265_v16 = vmul.f32 %v263_v4, %v261_v10  ;;  %v266_v17 = vmul.f32 %v264_v5, %v262_v15  ;;  %v271_v18 = vmul.f32 %v269_v6, %v262_v15  ;;  %v272_v19 = vmul.f32 %v270_v7, %v261_v10 }
  0x14   : > { %v253_v20 = vadd.f32 %v252_v12, %v251_v11  ;;  %v259_v21 = vadd.f32 %v258_v14, %v257_v13 }
  0x15   : > { %v267_v22 = vadd.f32 %v266_v17, %v265_v16  ;;  %v273_v23 = vadd.f32 %v272_v19, %v271_v18 }
  0x16   : > { %254 = vst [vmem:[%s246_s11] sm:$0xf] %v253_v20  ;;  %260 = vst [vmem:[%s246_s11 + $0x8] sm:$0xf] %v259_v21 }
  0x17   : > { %268 = vst [vmem:[%s246_s11 + $0x4] sm:$0xf] %v267_v22  ;;  %274 = vst [vmem:[%s246_s11 + $0xc] sm:$0xf] %v273_v23 }
  0x18 PF: > { %s13_s14 = sadd.s32 1, %s459_s14   ;;  %s542_s12 = smov %s455_s13 }
  0x19   : > { %p10_p5 = scmp.ge.s32.totalorder %s13_s14, 4   ;;  %s543_s13 = smov %s545_s15 }
  0x1b   :  { %12 = sbr.rel (!%p10_p5) target bundleno = 2 (0x2), region = 68 }

</bundles_post_ra>
